<compile_context>
chip_gen: v7x
topology: tpu7x:2x2x1
jax: 0.10.0
libtpu: 0.0.40
codegen_flags: <defaults>
</compile_context>

<pallas_src>
import jax
import jax.numpy as jnp
from jax.experimental import pallas as pl
from jax.experimental.pallas import tpu as pltpu


def _round_up(a, b):
    return ((a + b - 1) // b) * b


def _default_compute_dtype():
    # bf16 count/table math on bf16-native VPUs (v6e / v7x); f32 elsewhere
    # (v5e and older have no bf16 VALU path, so bf16 elementwise would be
    # emulated there).
    try:
        kind = jax.devices()[0].device_kind.lower()
    except Exception:
        return jnp.float32
    if any(tag in kind for tag in ("v2", "v3", "v4", "v5")):
        return jnp.float32
    return jnp.bfloat16


def _make_kernel(P, F, D, segments, compute_dtype):
    """segments: static list of (feature f, lane_lo, lane_hi) windows."""

    def kernel(xp_ref, tbl_ref, o_ref):
        # xp_ref : (rows, P*F) int32 — packed, starts-folded indices
        # tbl_ref: (num_emb_pad, D)  — resident embedding table (compute dtype)
        # o_ref  : (rows, P*D)       — lane-dense output tile (P tokens / row)
        idx = xp_ref[...]
        rows = idx.shape[0]

        accs = [jnp.zeros((rows, D), jnp.float32) for _ in range(P)]
        for (f, c0, c1) in segments:               # static, windowed per feature
            width = c1 - c0
            lanes = jax.lax.broadcasted_iota(jnp.int32, (rows, width), 1) + c0
            tbl_chunk = tbl_ref[c0:c1, :]           # (width, D), static slice
            for j in range(P):                      # P packed tokens per row
                c = j * F + f
                onehot = (idx[:, c:c + 1] == lanes).astype(compute_dtype)
                accs[j] = accs[j] + jnp.dot(
                    onehot, tbl_chunk, preferred_element_type=jnp.float32)

        for j in range(P):
            o_ref[:, j * D:(j + 1) * D] = accs[j].astype(o_ref.dtype)

    return kernel


def cate_feature_embedding(x, table, num_uniq_values, *, tokens_per_tile=1024,
                           compute_dtype=None, k_chunk=1024):
    """x: (B, N, F) int, table: (num_emb, D) f32, num_uniq_values: static list
    of per-feature cardinalities (sum == num_emb). Returns (B, N, D)."""
    B, N, F = x.shape
    num_emb, D = table.shape
    cards = [int(c) for c in num_uniq_values]
    assert len(cards) == F and sum(cards) == num_emb

    if compute_dtype is None:
        compute_dtype = _default_compute_dtype()
    cbytes = jnp.dtype(compute_dtype).itemsize

    M = B * N
    LANE = 128
    num_emb_pad = _round_up(num_emb, LANE)

    # Static per-feature lane windows (128-aligned), chunked to <= k_chunk.
    starts_py = [0]
    for c in cards[:-1]:
        starts_py.append(starts_py[-1] + c)
    segments = []
    for f, (s, c) in enumerate(zip(starts_py, cards)):
        lo = (s // LANE) * LANE
        hi = min(_round_up(s + c, LANE), num_emb_pad)
        k0 = lo
        while k0 < hi:
            k1 = min(k0 + k_chunk, hi)
            segments.append((f, k0, k1))
            k0 = k1
    max_seg = max(c1 - c0 for _, c0, c1 in segments)

    # Pack P tokens per output row so the stored row is lane-dense (>=128 wide).
    P = 128 // D if (D < 128 and 128 % D == 0) else 1
    out_w = P * D
    unit = 8 * P                                   # token granule = 8 output rows

    # Tile sizing against an explicit VMEM budget (works on v5e/v6e/v7x).
    VMEM_LIMIT = 32 * 1024 * 1024
    budget = (3 * VMEM_LIMIT) // 4

    def est(tpt):
        rows = tpt // P
        b = 2 * rows * (P * F) * 4                 # double-buffered index tiles
        b += 2 * rows * out_w * 4                  # double-buffered output tiles
        b += 2 * num_emb_pad * D * cbytes          # resident (pipelined) table
        b += rows * max_seg * (4 + 2 * cbytes)     # iota + compare/one-hot temps
        b += max_seg * D * cbytes                  # table chunk value
        b += P * rows * D * 4                      # per-slot f32 accumulators
        return b

    tpt = max(unit, (tokens_per_tile // unit) * unit)
    while tpt > unit and est(tpt) > budget:
        tpt = max(unit, ((tpt // 2) // unit) * unit)
    units_total = _round_up(M, unit) // unit
    tpt = min(tpt, units_total * unit)
    if units_total >= 2:                           # keep >=2 tiles: v7x has 2 TCs
        tpt = min(tpt, ((units_total + 1) // 2) * unit)
    M_pad = _round_up(M, tpt)
    rows_per_tile = tpt // P
    n_tiles = M_pad // tpt

    # Fold `starts` into the indices (cheap fused XLA add), pad, pack P/row.
    starts_arr = jnp.asarray(starts_py, dtype=jnp.int32).reshape(1, F)
    x2 = x.reshape(M, F).astype(jnp.int32) + starts_arr
    if M_pad > M:
        x2 = jnp.pad(x2, ((0, M_pad - M), (0, 0)))  # padded rows sliced off below
    xp = x2.reshape(M_pad // P, P * F)

    tbl = table.astype(compute_dtype)
    if num_emb_pad > num_emb:
        tbl = jnp.pad(tbl, ((0, num_emb_pad - num_emb), (0, 0)))

    kernel = _make_kernel(P, F, D, segments, compute_dtype)

    out2 = pl.pallas_call(
        kernel,
        out_shape=jax.ShapeDtypeStruct((M_pad // P, out_w), table.dtype),
        grid_spec=pltpu.PrefetchScalarGridSpec(
            num_scalar_prefetch=0,
            grid=(n_tiles,),
            in_specs=[
                pl.BlockSpec((rows_per_tile, P * F), lambda i: (i, 0)),   # indices
                pl.BlockSpec((num_emb_pad, D), lambda i: (0, 0)),          # table (constant map -> no re-DMA)
            ],
            out_specs=pl.BlockSpec((rows_per_tile, out_w), lambda i: (i, 0)),
        ),
        compiler_params=pltpu.CompilerParams(
            dimension_semantics=("parallel",),
            vmem_limit_bytes=VMEM_LIMIT,
        ),
    )(xp, tbl)

    # (M_pad//P, P*D) row-major is bit-identical to (M_pad, D); drop padding.
    return out2.reshape(M_pad, D)[:M].reshape(B, N, D)


if __name__ == "__main__":
    key = jax.random.PRNGKey(0)

    # Module config (synthetic, deterministic init).
    num_uniq_values = [5, 7, 4]          # F = 3 categorical features
    embed_dim = 32
    B, N = 2, 8

    F = len(num_uniq_values)
    num_emb = sum(num_uniq_values)
    starts_py = [0]
    for c in num_uniq_values[:-1]:
        starts_py.append(starts_py[-1] + c)
    starts = jnp.asarray(starts_py, dtype=jnp.int32)            # (F,)

    k_tab, *k_feats = jax.random.split(key, 1 + F)
    # nn.Embedding default init ~ N(0, 1)
    table = jax.random.normal(k_tab, (num_emb, embed_dim), dtype=jnp.float32)

    # Valid categorical inputs: 0 <= x[..., f] < num_uniq_values[f]
    cols = [
        jax.random.randint(k_feats[f], (B, N, 1), 0, num_uniq_values[f],
                           dtype=jnp.int32)
        for f in range(F)
    ]
    x = jnp.concatenate(cols, axis=-1)   # (B, N, F)

    # Pure-JAX reference.
    ref = table[(x + starts.reshape(1, 1, F))].sum(axis=-2)

    # f32 compute path (exact).
    out_f32 = cate_feature_embedding(x, table, num_uniq_values,
                                     compute_dtype=jnp.float32)
    out_f32 = jax.block_until_ready(out_f32)
    assert out_f32.shape == (B, N, embed_dim)
    assert jnp.allclose(out_f32, ref, atol=1e-5, rtol=1e-5), "f32 mismatch vs reference"

    # bf16 compute path (bf16-native VPU/MXU on v6e/v7x); table cast -> loose tol.
    out_bf16 = cate_feature_embedding(x, table, num_uniq_values,
                                      compute_dtype=jnp.bfloat16)
    out_bf16 = jax.block_until_ready(out_bf16)
    assert jnp.allclose(out_bf16, ref, atol=3e-2, rtol=3e-2), "bf16 mismatch vs reference"

    # Auto (generation-dependent) compute dtype.
    out_auto = cate_feature_embedding(x, table, num_uniq_values)
    out_auto = jax.block_until_ready(out_auto)
    assert jnp.allclose(out_auto, ref, atol=3e-2, rtol=3e-2), "auto mismatch vs reference"

    print("KERNEL_OK")
</pallas_src>

<mosaic_0001>
module attributes {stable_mosaic.version = 11 : i64} {
  func.func @kernel(%arg0: i32, %arg1: memref<8x12xi32, #tpu.memory_space<vmem>>, %arg2: memref<128x32xf32, #tpu.memory_space<vmem>>, %arg3: memref<8x128xf32, #tpu.memory_space<vmem>>) attributes {dimension_semantics = [#tpu.dimension_semantics<parallel>], iteration_bounds = array<i64: 1>, scalar_prefetch = 0 : i64, scratch_operands = 0 : i64, tpu.core_type = #tpu.core_type<tc>, window_params = [{transform_indices = @transform_0, window_bounds = array<i64: 8, 12>}, {pipeline_mode = #tpu.pipeline_mode<synchronous>, transform_indices = @transform_1, window_bounds = array<i64: 128, 32>}, {transform_indices = @transform_2, window_bounds = array<i64: 8, 128>}]} {
    %c0 = arith.constant 0 : index
    %c0_0 = arith.constant 0 : index
    %0 = vector.load %arg1[%c0, %c0_0] : memref<8x12xi32, #tpu.memory_space<vmem>>, vector<8x12xi32>
    %cst = arith.constant 0.000000e+00 : f32
    %1 = vector.broadcast %cst : f32 to vector<8x32xf32>
    %cst_1 = arith.constant 0.000000e+00 : f32
    %2 = vector.broadcast %cst_1 : f32 to vector<8x32xf32>
    %cst_2 = arith.constant 0.000000e+00 : f32
    %3 = vector.broadcast %cst_2 : f32 to vector<8x32xf32>
    %cst_3 = arith.constant 0.000000e+00 : f32
    %4 = vector.broadcast %cst_3 : f32 to vector<8x32xf32>
    %5 = tpu.iota {dimensions = array<i32: 1>} : vector<8x128xi32>
    %c0_i32 = arith.constant 0 : i32
    %6 = vector.broadcast %c0_i32 : i32 to vector<8x128xi32>
    %7 = arith.addi %5, %6 : vector<8x128xi32>
    %c0_4 = arith.constant 0 : index
    %c0_5 = arith.constant 0 : index
    %8 = vector.load %arg2[%c0_4, %c0_5] : memref<128x32xf32, #tpu.memory_space<vmem>>, vector<128x32xf32>
    %9 = vector.extract_strided_slice %0 {offsets = [0, 0], sizes = [8, 1], strides = [1, 1]} : vector<8x12xi32> to vector<8x1xi32>
    %10 = vector.broadcast %9 : vector<8x1xi32> to vector<8x128xi32>
    %11 = arith.cmpi eq, %10, %7 : vector<8x128xi32>
    %12 = arith.extui %11 : vector<8x128xi1> to vector<8x128xi32>
    %13 = arith.sitofp %12 : vector<8x128xi32> to vector<8x128xf32>
    %cst_6 = arith.constant dense<0.000000e+00> : vector<8x32xf32>
    %14 = tpu.matmul %13, %8, %cst_6 {dimension_numbers = #tpu.dot_dimension_numbers<[1], [0], [0], [1], [0, 0, 1, 1], [], []>} : vector<8x128xf32>, vector<128x32xf32>, vector<8x32xf32> -> vector<8x32xf32>
    %15 = arith.addf %1, %14 : vector<8x32xf32>
    %16 = vector.extract_strided_slice %0 {offsets = [0, 3], sizes = [8, 1], strides = [1, 1]} : vector<8x12xi32> to vector<8x1xi32>
    %17 = vector.broadcast %16 : vector<8x1xi32> to vector<8x128xi32>
    %18 = arith.cmpi eq, %17, %7 : vector<8x128xi32>
    %19 = arith.extui %18 : vector<8x128xi1> to vector<8x128xi32>
    %20 = arith.sitofp %19 : vector<8x128xi32> to vector<8x128xf32>
    %cst_7 = arith.constant dense<0.000000e+00> : vector<8x32xf32>
    %21 = tpu.matmul %20, %8, %cst_7 {dimension_numbers = #tpu.dot_dimension_numbers<[1], [0], [0], [1], [0, 0, 1, 1], [], []>} : vector<8x128xf32>, vector<128x32xf32>, vector<8x32xf32> -> vector<8x32xf32>
    %22 = arith.addf %2, %21 : vector<8x32xf32>
    %23 = vector.extract_strided_slice %0 {offsets = [0, 6], sizes = [8, 1], strides = [1, 1]} : vector<8x12xi32> to vector<8x1xi32>
    %24 = vector.broadcast %23 : vector<8x1xi32> to vector<8x128xi32>
    %25 = arith.cmpi eq, %24, %7 : vector<8x128xi32>
    %26 = arith.extui %25 : vector<8x128xi1> to vector<8x128xi32>
    %27 = arith.sitofp %26 : vector<8x128xi32> to vector<8x128xf32>
    %cst_8 = arith.constant dense<0.000000e+00> : vector<8x32xf32>
    %28 = tpu.matmul %27, %8, %cst_8 {dimension_numbers = #tpu.dot_dimension_numbers<[1], [0], [0], [1], [0, 0, 1, 1], [], []>} : vector<8x128xf32>, vector<128x32xf32>, vector<8x32xf32> -> vector<8x32xf32>
    %29 = arith.addf %3, %28 : vector<8x32xf32>
    %30 = vector.extract_strided_slice %0 {offsets = [0, 9], sizes = [8, 1], strides = [1, 1]} : vector<8x12xi32> to vector<8x1xi32>
    %31 = vector.broadcast %30 : vector<8x1xi32> to vector<8x128xi32>
    %32 = arith.cmpi eq, %31, %7 : vector<8x128xi32>
    %33 = arith.extui %32 : vector<8x128xi1> to vector<8x128xi32>
    %34 = arith.sitofp %33 : vector<8x128xi32> to vector<8x128xf32>
    %cst_9 = arith.constant dense<0.000000e+00> : vector<8x32xf32>
    %35 = tpu.matmul %34, %8, %cst_9 {dimension_numbers = #tpu.dot_dimension_numbers<[1], [0], [0], [1], [0, 0, 1, 1], [], []>} : vector<8x128xf32>, vector<128x32xf32>, vector<8x32xf32> -> vector<8x32xf32>
    %36 = arith.addf %4, %35 : vector<8x32xf32>
    %37 = tpu.iota {dimensions = array<i32: 1>} : vector<8x128xi32>
    %c0_i32_10 = arith.constant 0 : i32
    %38 = vector.broadcast %c0_i32_10 : i32 to vector<8x128xi32>
    %39 = arith.addi %37, %38 : vector<8x128xi32>
    %c0_11 = arith.constant 0 : index
    %c0_12 = arith.constant 0 : index
    %40 = vector.load %arg2[%c0_11, %c0_12] : memref<128x32xf32, #tpu.memory_space<vmem>>, vector<128x32xf32>
    %41 = vector.extract_strided_slice %0 {offsets = [0, 1], sizes = [8, 1], strides = [1, 1]} : vector<8x12xi32> to vector<8x1xi32>
    %42 = vector.broadcast %41 : vector<8x1xi32> to vector<8x128xi32>
    %43 = arith.cmpi eq, %42, %39 : vector<8x128xi32>
    %44 = arith.extui %43 : vector<8x128xi1> to vector<8x128xi32>
    %45 = arith.sitofp %44 : vector<8x128xi32> to vector<8x128xf32>
    %cst_13 = arith.constant dense<0.000000e+00> : vector<8x32xf32>
    %46 = tpu.matmul %45, %40, %cst_13 {dimension_numbers = #tpu.dot_dimension_numbers<[1], [0], [0], [1], [0, 0, 1, 1], [], []>} : vector<8x128xf32>, vector<128x32xf32>, vector<8x32xf32> -> vector<8x32xf32>
    %47 = arith.addf %15, %46 : vector<8x32xf32>
    %48 = vector.extract_strided_slice %0 {offsets = [0, 4], sizes = [8, 1], strides = [1, 1]} : vector<8x12xi32> to vector<8x1xi32>
    %49 = vector.broadcast %48 : vector<8x1xi32> to vector<8x128xi32>
    %50 = arith.cmpi eq, %49, %39 : vector<8x128xi32>
    %51 = arith.extui %50 : vector<8x128xi1> to vector<8x128xi32>
    %52 = arith.sitofp %51 : vector<8x128xi32> to vector<8x128xf32>
    %cst_14 = arith.constant dense<0.000000e+00> : vector<8x32xf32>
    %53 = tpu.matmul %52, %40, %cst_14 {dimension_numbers = #tpu.dot_dimension_numbers<[1], [0], [0], [1], [0, 0, 1, 1], [], []>} : vector<8x128xf32>, vector<128x32xf32>, vector<8x32xf32> -> vector<8x32xf32>
    %54 = arith.addf %22, %53 : vector<8x32xf32>
    %55 = vector.extract_strided_slice %0 {offsets = [0, 7], sizes = [8, 1], strides = [1, 1]} : vector<8x12xi32> to vector<8x1xi32>
    %56 = vector.broadcast %55 : vector<8x1xi32> to vector<8x128xi32>
    %57 = arith.cmpi eq, %56, %39 : vector<8x128xi32>
    %58 = arith.extui %57 : vector<8x128xi1> to vector<8x128xi32>
    %59 = arith.sitofp %58 : vector<8x128xi32> to vector<8x128xf32>
    %cst_15 = arith.constant dense<0.000000e+00> : vector<8x32xf32>
    %60 = tpu.matmul %59, %40, %cst_15 {dimension_numbers = #tpu.dot_dimension_numbers<[1], [0], [0], [1], [0, 0, 1, 1], [], []>} : vector<8x128xf32>, vector<128x32xf32>, vector<8x32xf32> -> vector<8x32xf32>
    %61 = arith.addf %29, %60 : vector<8x32xf32>
    %62 = vector.extract_strided_slice %0 {offsets = [0, 10], sizes = [8, 1], strides = [1, 1]} : vector<8x12xi32> to vector<8x1xi32>
    %63 = vector.broadcast %62 : vector<8x1xi32> to vector<8x128xi32>
    %64 = arith.cmpi eq, %63, %39 : vector<8x128xi32>
    %65 = arith.extui %64 : vector<8x128xi1> to vector<8x128xi32>
    %66 = arith.sitofp %65 : vector<8x128xi32> to vector<8x128xf32>
    %cst_16 = arith.constant dense<0.000000e+00> : vector<8x32xf32>
    %67 = tpu.matmul %66, %40, %cst_16 {dimension_numbers = #tpu.dot_dimension_numbers<[1], [0], [0], [1], [0, 0, 1, 1], [], []>} : vector<8x128xf32>, vector<128x32xf32>, vector<8x32xf32> -> vector<8x32xf32>
    %68 = arith.addf %36, %67 : vector<8x32xf32>
    %69 = tpu.iota {dimensions = array<i32: 1>} : vector<8x128xi32>
    %c0_i32_17 = arith.constant 0 : i32
    %70 = vector.broadcast %c0_i32_17 : i32 to vector<8x128xi32>
    %71 = arith.addi %69, %70 : vector<8x128xi32>
    %c0_18 = arith.constant 0 : index
    %c0_19 = arith.constant 0 : index
    %72 = vector.load %arg2[%c0_18, %c0_19] : memref<128x32xf32, #tpu.memory_space<vmem>>, vector<128x32xf32>
    %73 = vector.extract_strided_slice %0 {offsets = [0, 2], sizes = [8, 1], strides = [1, 1]} : vector<8x12xi32> to vector<8x1xi32>
    %74 = vector.broadcast %73 : vector<8x1xi32> to vector<8x128xi32>
    %75 = arith.cmpi eq, %74, %71 : vector<8x128xi32>
    %76 = arith.extui %75 : vector<8x128xi1> to vector<8x128xi32>
    %77 = arith.sitofp %76 : vector<8x128xi32> to vector<8x128xf32>
    %cst_20 = arith.constant dense<0.000000e+00> : vector<8x32xf32>
    %78 = tpu.matmul %77, %72, %cst_20 {dimension_numbers = #tpu.dot_dimension_numbers<[1], [0], [0], [1], [0, 0, 1, 1], [], []>} : vector<8x128xf32>, vector<128x32xf32>, vector<8x32xf32> -> vector<8x32xf32>
    %79 = arith.addf %47, %78 : vector<8x32xf32>
    %80 = vector.extract_strided_slice %0 {offsets = [0, 5], sizes = [8, 1], strides = [1, 1]} : vector<8x12xi32> to vector<8x1xi32>
    %81 = vector.broadcast %80 : vector<8x1xi32> to vector<8x128xi32>
    %82 = arith.cmpi eq, %81, %71 : vector<8x128xi32>
    %83 = arith.extui %82 : vector<8x128xi1> to vector<8x128xi32>
    %84 = arith.sitofp %83 : vector<8x128xi32> to vector<8x128xf32>
    %cst_21 = arith.constant dense<0.000000e+00> : vector<8x32xf32>
    %85 = tpu.matmul %84, %72, %cst_21 {dimension_numbers = #tpu.dot_dimension_numbers<[1], [0], [0], [1], [0, 0, 1, 1], [], []>} : vector<8x128xf32>, vector<128x32xf32>, vector<8x32xf32> -> vector<8x32xf32>
    %86 = arith.addf %54, %85 : vector<8x32xf32>
    %87 = vector.extract_strided_slice %0 {offsets = [0, 8], sizes = [8, 1], strides = [1, 1]} : vector<8x12xi32> to vector<8x1xi32>
    %88 = vector.broadcast %87 : vector<8x1xi32> to vector<8x128xi32>
    %89 = arith.cmpi eq, %88, %71 : vector<8x128xi32>
    %90 = arith.extui %89 : vector<8x128xi1> to vector<8x128xi32>
    %91 = arith.sitofp %90 : vector<8x128xi32> to vector<8x128xf32>
    %cst_22 = arith.constant dense<0.000000e+00> : vector<8x32xf32>
    %92 = tpu.matmul %91, %72, %cst_22 {dimension_numbers = #tpu.dot_dimension_numbers<[1], [0], [0], [1], [0, 0, 1, 1], [], []>} : vector<8x128xf32>, vector<128x32xf32>, vector<8x32xf32> -> vector<8x32xf32>
    %93 = arith.addf %61, %92 : vector<8x32xf32>
    %94 = vector.extract_strided_slice %0 {offsets = [0, 11], sizes = [8, 1], strides = [1, 1]} : vector<8x12xi32> to vector<8x1xi32>
    %95 = vector.broadcast %94 : vector<8x1xi32> to vector<8x128xi32>
    %96 = arith.cmpi eq, %95, %71 : vector<8x128xi32>
    %97 = arith.extui %96 : vector<8x128xi1> to vector<8x128xi32>
    %98 = arith.sitofp %97 : vector<8x128xi32> to vector<8x128xf32>
    %cst_23 = arith.constant dense<0.000000e+00> : vector<8x32xf32>
    %99 = tpu.matmul %98, %72, %cst_23 {dimension_numbers = #tpu.dot_dimension_numbers<[1], [0], [0], [1], [0, 0, 1, 1], [], []>} : vector<8x128xf32>, vector<128x32xf32>, vector<8x32xf32> -> vector<8x32xf32>
    %100 = arith.addf %68, %99 : vector<8x32xf32>
    %c0_24 = arith.constant 0 : index
    %c0_25 = arith.constant 0 : index
    %101 = vector.load %arg3[%c0_24, %c0_25] : memref<8x128xf32, #tpu.memory_space<vmem>>, vector<8x32xf32>
    tpu.vector_store %arg3[%c0_24, %c0_25], %79 {strides = array<i32>} : memref<8x128xf32, #tpu.memory_space<vmem>>, vector<8x32xf32>,
    %c0_26 = arith.constant 0 : index
    %c32 = arith.constant 32 : index
    %102 = vector.load %arg3[%c0_26, %c32] : memref<8x128xf32, #tpu.memory_space<vmem>>, vector<8x32xf32>
    tpu.vector_store %arg3[%c0_26, %c32], %86 {strides = array<i32>} : memref<8x128xf32, #tpu.memory_space<vmem>>, vector<8x32xf32>,
    %c0_27 = arith.constant 0 : index
    %c64 = arith.constant 64 : index
    %103 = vector.load %arg3[%c0_27, %c64] : memref<8x128xf32, #tpu.memory_space<vmem>>, vector<8x32xf32>
    tpu.vector_store %arg3[%c0_27, %c64], %93 {strides = array<i32>} : memref<8x128xf32, #tpu.memory_space<vmem>>, vector<8x32xf32>,
    %c0_28 = arith.constant 0 : index
    %c96 = arith.constant 96 : index
    %104 = vector.load %arg3[%c0_28, %c96] : memref<8x128xf32, #tpu.memory_space<vmem>>, vector<8x32xf32>
    tpu.vector_store %arg3[%c0_28, %c96], %100 {strides = array<i32>} : memref<8x128xf32, #tpu.memory_space<vmem>>, vector<8x32xf32>,
    return
  }
  func.func @transform_0(%arg0: i32) -> (i32, i32) {
    %c0_i32 = arith.constant 0 : i32
    %c0_i32_0 = arith.constant 0 : i32
    return %arg0, %c0_i32 : i32, i32
  }
  func.func @transform_1(%arg0: i32) -> (i32, i32) {
    %c0_i32 = arith.constant 0 : i32
    %c0_i32_0 = arith.constant 0 : i32
    %c0_i32_1 = arith.constant 0 : i32
    return %c0_i32, %c0_i32_0 : i32, i32
  }
  func.func @transform_2(%arg0: i32) -> (i32, i32) {
    %c0_i32 = arith.constant 0 : i32
    %c0_i32_0 = arith.constant 0 : i32
    return %arg0, %c0_i32 : i32, i32
  }
}

</mosaic_0001>

<bundles_post_ra>
// kernel: tpu_custom_call.1
= control target key start
LH: loop header
LB: loop body
LE: loop exit
PB: predicated region body
PF: predicated region fallthrough
CT: control target
= control target key end

     0   :  { %v1989_v2 = vmov 1   ;;  %v1990_v3 = vmov 0   ;;  %v1991_v8 = vmov 0.0|0.0   ;;  %v1992_v10 = vmov 4   ;;  %s2359_s0 = inlined_call_operand.vmem [shape: s32[8,12], index: 0, kind: input, shape index: {}]   ;;  %s2360_s1 = inlined_call_operand.vmem [shape: f32[128,32], index: 1, kind: input, shape index: {}]   ;;  %s2361_s2 = inlined_call_operand.hbm [shape: f32[8,128], index: 2, kind: output, shape index: {}]  }
   0x1   :  { %v2027_v0 = vld [vmem:[%s2359_s0] sm:$0xff]  ;;  %1953 = vset.pattern.permute.xlu0 %v1989_v2  ;;  %1955 = vset.pattern.permute.xlu1 %v1990_v3  ;;  %v16_v4 = vld [vmem:[%s2360_s1 + $0x8] sm:$0xff]  ;;  %v17_v5 = vld [vmem:[%s2360_s1 + $0x10] sm:$0xff]  ;;  %v1993_v11 = vmov 3  }
   0x2   :  { %v15_v1 = vld [vmem:[%s2360_s1] sm:$0xff]  ;;  %56 = vperm.xlu0 %1953, %v2027_v0   ;;  %32 = vperm.xlu1 %1955, %v2027_v0   ;;  %v18_v7 = vld [vmem:[%s2360_s1 + $0x18] sm:$0xff]  ;;  %v20_v13 = vld [vmem:[%s2360_s1 + $0x28] sm:$0xff] }
   0x3   :  { %v2040_v6 = vpack.c.bf16 %v16_v4, %v15_v1  ;;  %1629 = vmatprep.subr.bf16.mxu0 %v1991_v8  ;;  %1677 = vmatprep.subr.bf16.mxu1 %v1991_v8  ;;  %v2048_v9 = vpack.c.bf16 %v18_v7, %v17_v5  ;;  %v19_v12 = vld [vmem:[%s2360_s1 + $0x20] sm:$0xff] }
   0x5   :  { %1631 = vmatpush3.bf16.msra.mxu0 %v2040_v6  ;;  %1679 = vmatpush3.bf16.msra.mxu1 %v2040_v6 }
   0x6   :  { %1632 = vmatprep.subr.bf16.mxu0 %v1991_v8  ;;  %1680 = vmatprep.subr.bf16.mxu1 %v1991_v8 }
   0x7   :  { %1954 = vset.pattern.permute.xlu0 %v1992_v10  ;;  %1956 = vset.pattern.permute.xlu1 %v1993_v11 }
   0x8   :  { %7 = vsyncpa [#allocation3], 0  ;;  %202 = vperm.xlu0 %1954, %v2027_v0   ;;  %38 = vperm.xlu1 %1956, %v2027_v0   ;;  %v2064_v14 = vpack.c.bf16 %v20_v13, %v19_v12  ;;  %v21_v15 = vld [vmem:[%s2360_s1 + $0x30] sm:$0xff]  ;;  %v22_v16 = vld [vmem:[%s2360_s1 + $0x38] sm:$0xff]  ;;  %vm1994_vm0 = vmmov 0   ;;  %v1995_v17 = vmov 0.0   ;;  %v13_v39 = vlaneseq }
   0x9   :  { %1634 = vmatpush3.bf16.msra.mxu0 %v2048_v9  ;;  %1682 = vmatpush3.bf16.msra.mxu1 %v2048_v9  ;;  %v1996_v18 = vmov 7   ;;  %v1997_v19 = vmov 10   ;;  %v2080_v20 = vpack.c.bf16 %v22_v16, %v21_v15  ;;  %v23_v21 = vld [vmem:[%s2360_s1 + $0x40] sm:$0xff]  ;;  %v24_v22 = vld [vmem:[%s2360_s1 + $0x48] sm:$0xff]  ;;  %v1998_v23 = vmov 6   ;;  %v25_v26 = vld [vmem:[%s2360_s1 + $0x50] sm:$0xff] }
   0xa   :  { %1635 = vmatprep.subr.bf16.mxu0 %v1991_v8  ;;  %1683 = vmatprep.subr.bf16.mxu1 %v1991_v8  ;;  %v1999_v24 = vmov 2   ;;  %v2093_v25 = vpack.c.bf16 %v24_v22, %v23_v21  ;;  %v26_v27 = vld [vmem:[%s2360_s1 + $0x58] sm:$0xff]  ;;  %v2000_v28 = vmov 9   ;;  %v27_v30 = vld [vmem:[%s2360_s1 + $0x60] sm:$0xff]  ;;  %v28_v31 = vld [vmem:[%s2360_s1 + $0x68] sm:$0xff]  ;;  %v2001_v35 = vmov 5  }
   0xb   :  { %1241 = vmatprep.mubr.msk.f32.mxu0 %vm1994_vm0, %v1995_v17  ;;  %1311 = vmatprep.mubr.msk.f32.mxu1 %vm1994_vm0, %v1995_v17  ;;  %v2106_v29 = vpack.c.bf16 %v26_v27, %v25_v26  ;;  %v2119_v32 = vpack.c.bf16 %v28_v31, %v27_v30  ;;  %v29_v33 = vld [vmem:[%s2360_s1 + $0x70] sm:$0xff]  ;;  %v30_v34 = vld [vmem:[%s2360_s1 + $0x78] sm:$0xff]  ;;  %v2002_v37 = vmov 8   ;;  %v2003_v38 = vmov 11   ;;  %s2005_s1 = smov 32   ;;  %s2006_s14 = smov 64  }
   0xc   :  { %1957 = vset.pattern.permute.xlu1 %v1996_v18  ;;  %1958 = vset.pattern.permute.xlu0 %v1997_v19  ;;  %v2132_v36 = vpack.c.bf16 %v30_v34, %v29_v33  ;;  %v2143_v40 = vand.u32 127, %v13_v39  ;;  %v2004_v42 = vmov 1.0   ;;  %vm947_vm13 = vcmask 261120   ;;  %s2007_s15 = smov 96   ;;  %s2008_s16 = smov [#allocation2]  }
   0xd   :  { %348 = vperm.xlu1 %1957, %v2027_v0   ;;  %494 = vperm.xlu0 %1958, %v2027_v0   ;;  %vm953_vm14 = vcmask 523520   ;;  %vm959_vm15 = vcmask 785920   ;;  %s973_s0 = sshll.u32 %s2008_s16, 4  ;;  %s974_s0 = int_to_ptr.vmem [resolvable:$true] %s973_s0 }
   0xe   :  { %1637 = vmatpush3.bf16.msra.mxu0 %v2064_v14  ;;  %1685 = vmatpush3.bf16.msra.mxu1 %v2064_v14  ;;  %s1965_s17 = scalar_lea.vmem %s974_s0, 128  ;;  %p1970_p1 = scmp.lt.s32.totalorder %s974_s0, %s974_s0 }
   0xf   :  { %1638 = vmatprep.subr.bf16.mxu0 %v1991_v8  ;;  %1686 = vmatprep.subr.bf16.mxu1 %v1991_v8  ;;  %p1966_p0 = scmp.ne.s32.totalorder %s974_s0, %s1965_s17  ;;  %p1971_p2 = scmp.lt.s32.totalorder %s1965_s17, %s1965_s17 }
  0x11   :  { %1959 = vset.pattern.permute.xlu1 %v1998_v23  ;;  %1961 = vset.pattern.permute.xlu0 %v1999_v24  ;;  %p1972_p3 = por %p1971_p2, %p1970_p1 }
  0x12   :  { %44 = vperm.xlu1 %1959, %v2027_v0   ;;  %1640 = vmatpush3.bf16.msra.mxu0 %v2080_v20 }
  0x13   :  { %1641 = vmatprep.subr.bf16.mxu0 %v1991_v8  ;;  %1688 = vmatpush3.bf16.msra.mxu1 %v2080_v20  ;;  %p1973_p4 = pnand %p1972_p3, %p1966_p0 }
  0x14   :  { %1689 = vmatprep.subr.bf16.mxu1 %v1991_v8  ;;  %640 = vperm.xlu0 %1961, %v2027_v0  }
  0x16   :  { %1960 = vset.pattern.permute.xlu1 %v2000_v28  ;;  %1643 = vmatpush3.bf16.msra.mxu0 %v2093_v25 }
  0x17   :  { %50 = vperm.xlu1 %1960, %v2027_v0   ;;  %1644 = vmatprep.subr.bf16.mxu0 %v1991_v8 }
  0x18   :  { %1691 = vmatpush3.bf16.msra.mxu1 %v2093_v25  ;;  %1964 = vset.pattern.permute.xlu0 %v2003_v38 }
  0x19   :  { %1692 = vmatprep.subr.bf16.mxu1 %v1991_v8  ;;  %871 = vperm.xlu0 %1964, %v2027_v0  }
  0x1a   :  { %1646 = vmatpush3.bf16.msra.mxu0 %v2106_v29 }
  0x1b   :  { %1647 = vmatprep.subr.bf16.mxu0 %v1991_v8  ;;  %1962 = vset.pattern.permute.xlu1 %v2001_v35 }
  0x1c   :  { %1694 = vmatpush3.bf16.msra.mxu1 %v2106_v29  ;;  %717 = vperm.xlu1 %1962, %v2027_v0  }
  0x1d   :  { %1695 = vmatprep.subr.bf16.mxu1 %v1991_v8 }
  0x1e   :  { %1649 = vmatpush3.bf16.msra.mxu0 %v2119_v32 }
  0x1f   :  { %1650 = vmatprep.subr.bf16.mxu0 %v1991_v8 }
  0x20   :  { %1697 = vmatpush3.bf16.msra.mxu1 %v2119_v32  ;;  %1963 = vset.pattern.permute.xlu1 %v2002_v37 }
  0x21   :  { %1698 = vmatprep.subr.bf16.mxu1 %v1991_v8  ;;  %794 = vperm.xlu1 %1963, %v2027_v0  }
  0x22   :  { %1652 = vmatpush3.bf16.msra.mxu0 %v2132_v36 }
  0x23   :  { %1653 = vmatprep.subr.bf16.mxu0 %v1991_v8 }
  0x24   :  { %1700 = vmatpush3.bf16.msra.mxu1 %v2132_v36 }
  0x25   :  { %1701 = vmatprep.subr.bf16.mxu1 %v1991_v8 }
  0x81   :  { %v57_v41 = vpop.permute.xlu0 %56  ;;  %v33_v44 = vpop.permute.xlu1 %32 }
  0x82   :  { %vm58_vm1 = vcmp.eq.s32.totalorder %v57_v41, %v2143_v40  ;;  %vm34_vm3 = vcmp.eq.s32.totalorder %v33_v44, %v2143_v40 }
  0x83   :  { %1242 = vmatmul.mubr.msk.f32.vlgmr.msra.gmra.mrb[0].mxu0 %vm58_vm1, %v2004_v42 }
  0x84   :  { %1655 = vmatpush3.bf16.msra.mxu0 %v2040_v6  ;;  %1276 = vmatprep.mubr.msk.f32.mxu0 %vm1994_vm0, %v1995_v17 }
  0x85   :  { %1656 = vmatprep.subr.bf16.mxu0 %v1991_v8 }
  0x87   :  { %v203_v43 = vpop.permute.xlu0 %202  ;;  %v39_v45 = vpop.permute.xlu1 %38 }
  0x88   :  { %vm204_vm2 = vcmp.eq.s32.totalorder %v203_v43, %v2143_v40  ;;  %1658 = vmatpush3.bf16.msra.mxu0 %v2048_v9  ;;  %vm40_vm4 = vcmp.eq.s32.totalorder %v39_v45, %v2143_v40 }
  0x89   :  { %1312 = vmatmul.mubr.msk.f32.vlgmr.msra.gmra.mrb[0].mxu1 %vm204_vm2, %v2004_v42  ;;  %1659 = vmatprep.subr.bf16.mxu0 %v1991_v8 }
  0x8a   :  { %1703 = vmatpush3.bf16.msra.mxu1 %v2040_v6  ;;  %1346 = vmatprep.mubr.msk.f32.mxu1 %vm1994_vm0, %v1995_v17 }
  0x8b   :  { %1704 = vmatprep.subr.bf16.mxu1 %v1991_v8 }
  0x8c   :  { %1661 = vmatpush3.bf16.msra.mxu0 %v2064_v14  ;;  %v349_v46 = vpop.permute.xlu1 %348  ;;  %v495_v47 = vpop.permute.xlu0 %494 }
  0x8d   :  { %1662 = vmatprep.subr.bf16.mxu0 %v1991_v8  ;;  %vm350_vm5 = vcmp.eq.s32.totalorder %v349_v46, %v2143_v40  ;;  %vm496_vm6 = vcmp.eq.s32.totalorder %v495_v47, %v2143_v40 }
  0x8e   :  { %1706 = vmatpush3.bf16.msra.mxu1 %v2048_v9 }
  0x8f   :  { %1707 = vmatprep.subr.bf16.mxu1 %v1991_v8 }
  0x90   :  { %1664 = vmatpush3.bf16.msra.mxu0 %v2080_v20 }
  0x91   :  { %1665 = vmatprep.subr.bf16.mxu0 %v1991_v8  ;;  %v45_v48 = vpop.permute.xlu1 %44 }
  0x92   :  { %1709 = vmatpush3.bf16.msra.mxu1 %v2064_v14  ;;  %vm46_vm7 = vcmp.eq.s32.totalorder %v45_v48, %v2143_v40 }
  0x93   :  { %1710 = vmatprep.subr.bf16.mxu1 %v1991_v8  ;;  %v641_v50 = vpop.permute.xlu0 %640 }
  0x94   :  { %1667 = vmatpush3.bf16.msra.mxu0 %v2093_v25  ;;  %vm642_vm9 = vcmp.eq.s32.totalorder %v641_v50, %v2143_v40 }
  0x95   :  { %1668 = vmatprep.subr.bf16.mxu0 %v1991_v8 }
  0x96   :  { %1712 = vmatpush3.bf16.msra.mxu1 %v2080_v20  ;;  %v51_v49 = vpop.permute.xlu1 %50 }
  0x97   :  { %1713 = vmatprep.subr.bf16.mxu1 %v1991_v8  ;;  %vm52_vm8 = vcmp.eq.s32.totalorder %v51_v49, %v2143_v40 }
  0x98   :  { %1670 = vmatpush3.bf16.msra.mxu0 %v2106_v29  ;;  %v872_v53 = vpop.permute.xlu0 %871 }
  0x99   :  { %1671 = vmatprep.subr.bf16.mxu0 %v1991_v8  ;;  %vm873_vm12 = vcmp.eq.s32.totalorder %v872_v53, %v2143_v40 }
  0x9a   :  { %1715 = vmatpush3.bf16.msra.mxu1 %v2093_v25 }
  0x9b   :  { %1716 = vmatprep.subr.bf16.mxu1 %v1991_v8  ;;  %v718_v51 = vpop.permute.xlu1 %717 }
  0x9c   :  { %1673 = vmatpush3.bf16.msra.mxu0 %v2119_v32  ;;  %vm719_vm10 = vcmp.eq.s32.totalorder %v718_v51, %v2143_v40 }
  0x9d   :  { %1674 = vmatprep.subr.bf16.mxu0 %v1991_v8 }
  0x9e   :  { %1718 = vmatpush3.bf16.msra.mxu1 %v2106_v29 }
  0x9f   :  { %1719 = vmatprep.subr.bf16.mxu1 %v1991_v8 }
  0xa0   :  { %1676 = vmatpush3.bf16.msra.mxu0 %v2132_v36  ;;  %v795_v52 = vpop.permute.xlu1 %794 }
  0xa1   :  { %1725 = vmatprep.subr.bf16.mxu0 %v1991_v8  ;;  %vm796_vm11 = vcmp.eq.s32.totalorder %v795_v52, %v2143_v40 }
  0xa2   :  { %1721 = vmatpush3.bf16.msra.mxu1 %v2119_v32 }
  0xa3   :  { %1722 = vmatprep.subr.bf16.mxu1 %v1991_v8  ;;  %1277 = vmatmul.mubr.msk.f32.vlgmr.msra.gmra.mrb[0].mxu0 %vm34_vm3, %v2004_v42 }
  0xa4   :  { %1727 = vmatpush3.bf16.msra.mxu0 %v2040_v6  ;;  %1381 = vmatprep.mubr.msk.f32.mxu0 %vm1994_vm0, %v1995_v17 }
  0xa5   :  { %1728 = vmatprep.subr.bf16.mxu0 %v1991_v8 }
  0xa6   :  { %1724 = vmatpush3.bf16.msra.mxu1 %v2132_v36 }
  0xa7   :  { %1773 = vmatprep.subr.bf16.mxu1 %v1991_v8 }
  0xa8   :  { %1730 = vmatpush3.bf16.msra.mxu0 %v2048_v9 }
  0xa9   :  { %1347 = vmatmul.mubr.msk.f32.vlgmr.msra.gmra.mrb[0].mxu1 %vm40_vm4, %v2004_v42  ;;  %1731 = vmatprep.subr.bf16.mxu0 %v1991_v8 }
  0xaa   :  { %1775 = vmatpush3.bf16.msra.mxu1 %v2040_v6  ;;  %1451 = vmatprep.mubr.msk.f32.mxu1 %vm1994_vm0, %v1995_v17 }
  0xab   :  { %1776 = vmatprep.subr.bf16.mxu1 %v1991_v8 }
  0xac   :  { %1733 = vmatpush3.bf16.msra.mxu0 %v2064_v14 }
  0xad   :  { %1734 = vmatprep.subr.bf16.mxu0 %v1991_v8 }
  0xae   :  { %1778 = vmatpush3.bf16.msra.mxu1 %v2048_v9 }
  0xaf   :  { %1779 = vmatprep.subr.bf16.mxu1 %v1991_v8 }
  0xb0   :  { %1736 = vmatpush3.bf16.msra.mxu0 %v2080_v20 }
  0xb1   :  { %1737 = vmatprep.subr.bf16.mxu0 %v1991_v8 }
  0xb2   :  { %1781 = vmatpush3.bf16.msra.mxu1 %v2064_v14 }
  0xb3   :  { %1782 = vmatprep.subr.bf16.mxu1 %v1991_v8 }
  0xb4   :  { %1739 = vmatpush3.bf16.msra.mxu0 %v2093_v25 }
  0xb5   :  { %1740 = vmatprep.subr.bf16.mxu0 %v1991_v8 }
  0xb6   :  { %1784 = vmatpush3.bf16.msra.mxu1 %v2080_v20 }
  0xb7   :  { %1785 = vmatprep.subr.bf16.mxu1 %v1991_v8 }
  0xb8   :  { %1742 = vmatpush3.bf16.msra.mxu0 %v2106_v29 }
  0xb9   :  { %1743 = vmatprep.subr.bf16.mxu0 %v1991_v8 }
  0xba   :  { %1787 = vmatpush3.bf16.msra.mxu1 %v2093_v25 }
  0xbb   :  { %1788 = vmatprep.subr.bf16.mxu1 %v1991_v8 }
  0xbc   :  { %1745 = vmatpush3.bf16.msra.mxu0 %v2119_v32 }
  0xbd   :  { %1746 = vmatprep.subr.bf16.mxu0 %v1991_v8 }
  0xbe   :  { %1790 = vmatpush3.bf16.msra.mxu1 %v2106_v29 }
  0xbf   :  { %1791 = vmatprep.subr.bf16.mxu1 %v1991_v8 }
  0xc0   :  { %1748 = vmatpush3.bf16.msra.mxu0 %v2132_v36 }
  0xc1   :  { %1749 = vmatprep.subr.bf16.mxu0 %v1991_v8 }
  0xc2   :  { %1793 = vmatpush3.bf16.msra.mxu1 %v2119_v32 }
  0xc3   :  { %1794 = vmatprep.subr.bf16.mxu1 %v1991_v8  ;;  %1382 = vmatmul.mubr.msk.f32.vlgmr.msra.gmra.mrb[2].mxu0 %vm350_vm5, %v2004_v42 }
  0xc4   :  { %1751 = vmatpush3.bf16.msra.mxu0 %v2040_v6  ;;  %1416 = vmatprep.mubr.msk.f32.mxu0 %vm1994_vm0, %v1995_v17 }
  0xc5   :  { %1752 = vmatprep.subr.bf16.mxu0 %v1991_v8 }
  0xc6   :  { %1796 = vmatpush3.bf16.msra.mxu1 %v2132_v36 }
  0xc7   :  { %1797 = vmatprep.subr.bf16.mxu1 %v1991_v8 }
  0xc8   :  { %1754 = vmatpush3.bf16.msra.mxu0 %v2048_v9 }
  0xc9   :  { %1452 = vmatmul.mubr.msk.f32.vlgmr.msra.gmra.mrb[2].mxu1 %vm496_vm6, %v2004_v42  ;;  %1755 = vmatprep.subr.bf16.mxu0 %v1991_v8 }
  0xca   :  { %1799 = vmatpush3.bf16.msra.mxu1 %v2040_v6  ;;  %1486 = vmatprep.mubr.msk.f32.mxu1 %vm1994_vm0, %v1995_v17 }
  0xcb   :  { %1800 = vmatprep.subr.bf16.mxu1 %v1991_v8 }
  0xcc   :  { %1757 = vmatpush3.bf16.msra.mxu0 %v2064_v14 }
  0xcd   :  { %1758 = vmatprep.subr.bf16.mxu0 %v1991_v8 }
  0xce   :  { %1802 = vmatpush3.bf16.msra.mxu1 %v2048_v9 }
  0xcf   :  { %1803 = vmatprep.subr.bf16.mxu1 %v1991_v8 }
  0xd0   :  { %1760 = vmatpush3.bf16.msra.mxu0 %v2080_v20 }
  0xd1   :  { %1761 = vmatprep.subr.bf16.mxu0 %v1991_v8 }
  0xd2   :  { %1805 = vmatpush3.bf16.msra.mxu1 %v2064_v14 }
  0xd3   :  { %1806 = vmatprep.subr.bf16.mxu1 %v1991_v8 }
  0xd4   :  { %1763 = vmatpush3.bf16.msra.mxu0 %v2093_v25 }
  0xd5   :  { %1764 = vmatprep.subr.bf16.mxu0 %v1991_v8 }
  0xd6   :  { %1808 = vmatpush3.bf16.msra.mxu1 %v2080_v20 }
  0xd7   :  { %1809 = vmatprep.subr.bf16.mxu1 %v1991_v8 }
  0xd8   :  { %1766 = vmatpush3.bf16.msra.mxu0 %v2106_v29 }
  0xd9   :  { %1767 = vmatprep.subr.bf16.mxu0 %v1991_v8 }
  0xda   :  { %1811 = vmatpush3.bf16.msra.mxu1 %v2093_v25 }
  0xdb   :  { %1812 = vmatprep.subr.bf16.mxu1 %v1991_v8 }
  0xdc   :  { %1769 = vmatpush3.bf16.msra.mxu0 %v2119_v32 }
  0xdd   :  { %1770 = vmatprep.subr.bf16.mxu0 %v1991_v8 }
  0xde   :  { %1814 = vmatpush3.bf16.msra.mxu1 %v2106_v29 }
  0xdf   :  { %1815 = vmatprep.subr.bf16.mxu1 %v1991_v8 }
  0xe0   :  { %1772 = vmatpush3.bf16.msra.mxu0 %v2132_v36 }
  0xe1   :  { %1821 = vmatprep.subr.bf16.mxu0 %v1991_v8 }
  0xe2   :  { %1817 = vmatpush3.bf16.msra.mxu1 %v2119_v32 }
  0xe3   :  { %1818 = vmatprep.subr.bf16.mxu1 %v1991_v8  ;;  %1417 = vmatmul.mubr.msk.f32.vlgmr.msra.gmra.mrb[2].mxu0 %vm46_vm7, %v2004_v42 }
  0xe4   :  { %1823 = vmatpush3.bf16.msra.mxu0 %v2040_v6  ;;  %1521 = vmatprep.mubr.msk.f32.mxu0 %vm1994_vm0, %v1995_v17 }
  0xe5   :  { %1824 = vmatprep.subr.bf16.mxu0 %v1991_v8 }
  0xe6   :  { %1820 = vmatpush3.bf16.msra.mxu1 %v2132_v36 }
  0xe7   :  { %1845 = vmatprep.subr.bf16.mxu1 %v1991_v8 }
  0xe8   :  { %1826 = vmatpush3.bf16.msra.mxu0 %v2048_v9 }
  0xe9   :  { %1487 = vmatmul.mubr.msk.f32.vlgmr.msra.gmra.mrb[2].mxu1 %vm52_vm8, %v2004_v42  ;;  %1827 = vmatprep.subr.bf16.mxu0 %v1991_v8 }
  0xea   :  { %1847 = vmatpush3.bf16.msra.mxu1 %v2040_v6  ;;  %1556 = vmatprep.mubr.msk.f32.mxu1 %vm1994_vm0, %v1995_v17 }
  0xeb   :  { %1848 = vmatprep.subr.bf16.mxu1 %v1991_v8 }
  0xec   :  { %1829 = vmatpush3.bf16.msra.mxu0 %v2064_v14 }
  0xed   :  { %1830 = vmatprep.subr.bf16.mxu0 %v1991_v8 }
  0xee   :  { %1850 = vmatpush3.bf16.msra.mxu1 %v2048_v9 }
  0xef   :  { %1851 = vmatprep.subr.bf16.mxu1 %v1991_v8 }
  0xf0   :  { %1832 = vmatpush3.bf16.msra.mxu0 %v2080_v20 }
  0xf1   :  { %1833 = vmatprep.subr.bf16.mxu0 %v1991_v8 }
  0xf2   :  { %1853 = vmatpush3.bf16.msra.mxu1 %v2064_v14 }
  0xf3   :  { %1854 = vmatprep.subr.bf16.mxu1 %v1991_v8 }
  0xf4   :  { %1835 = vmatpush3.bf16.msra.mxu0 %v2093_v25 }
  0xf5   :  { %1836 = vmatprep.subr.bf16.mxu0 %v1991_v8 }
  0xf6   :  { %1856 = vmatpush3.bf16.msra.mxu1 %v2080_v20 }
  0xf7   :  { %1857 = vmatprep.subr.bf16.mxu1 %v1991_v8 }
  0xf8   :  { %1838 = vmatpush3.bf16.msra.mxu0 %v2106_v29 }
  0xf9   :  { %1839 = vmatprep.subr.bf16.mxu0 %v1991_v8 }
  0xfa   :  { %1859 = vmatpush3.bf16.msra.mxu1 %v2093_v25 }
  0xfb   :  { %1860 = vmatprep.subr.bf16.mxu1 %v1991_v8 }
  0xfc   :  { %1841 = vmatpush3.bf16.msra.mxu0 %v2119_v32 }
  0xfd   :  { %1842 = vmatprep.subr.bf16.mxu0 %v1991_v8 }
  0xfe   :  { %1862 = vmatpush3.bf16.msra.mxu1 %v2106_v29 }
  0xff   :  { %1863 = vmatprep.subr.bf16.mxu1 %v1991_v8 }
 0x100   :  { %1844 = vmatpush3.bf16.msra.mxu0 %v2132_v36 }
 0x101   :  { %1869 = vmatprep.subr.bf16.mxu0 %v1991_v8 }
 0x102   :  { %1865 = vmatpush3.bf16.msra.mxu1 %v2119_v32 }
 0x103   :  { %1866 = vmatprep.subr.bf16.mxu1 %v1991_v8  ;;  %1522 = vmatmul.mubr.msk.f32.vlgmr.msra.gmra.mrb[0].mxu0 %vm642_vm9, %v2004_v42 }
 0x104   :  { %1871 = vmatpush3.bf16.msra.mxu0 %v2040_v6  ;;  %1591 = vmatprep.mubr.msk.f32.mxu0 %vm1994_vm0, %v1995_v17 }
 0x105   :  { %1872 = vmatprep.subr.bf16.mxu0 %v1991_v8 }
 0x106   :  { %1868 = vmatpush3.bf16.msra.mxu1 %v2132_v36 }
 0x107   :  { %1893 = vmatprep.subr.bf16.mxu1 %v1991_v8 }
 0x108   :  { %1874 = vmatpush3.bf16.msra.mxu0 %v2048_v9 }
 0x109   :  { %1557 = vmatmul.mubr.msk.f32.vlgmr.msra.gmra.mrb[0].mxu1 %vm719_vm10, %v2004_v42  ;;  %1875 = vmatprep.subr.bf16.mxu0 %v1991_v8 }
 0x10a   :  { %1895 = vmatpush3.bf16.msra.mxu1 %v2040_v6  ;;  %1626 = vmatprep.mubr.msk.f32.mxu1 %vm1994_vm0, %v1995_v17  ;;  %vm965_vm0 = vcmask 1048320  }
 0x10b   :  { %1896 = vmatprep.subr.bf16.mxu1 %v1991_v8 }
 0x10c   :  { %1877 = vmatpush3.bf16.msra.mxu0 %v2064_v14 }
 0x10d   :  { %1878 = vmatprep.subr.bf16.mxu0 %v1991_v8 }
 0x10e   :  { %1898 = vmatpush3.bf16.msra.mxu1 %v2048_v9 }
 0x10f   :  { %1899 = vmatprep.subr.bf16.mxu1 %v1991_v8 }
 0x110   :  { %1880 = vmatpush3.bf16.msra.mxu0 %v2080_v20 }
 0x111   :  { %1881 = vmatprep.subr.bf16.mxu0 %v1991_v8 }
 0x112   :  { %1901 = vmatpush3.bf16.msra.mxu1 %v2064_v14 }
 0x113   :  { %1902 = vmatprep.subr.bf16.mxu1 %v1991_v8 }
 0x114   :  { %1883 = vmatpush3.bf16.msra.mxu0 %v2093_v25 }
 0x115   :  { %1884 = vmatprep.subr.bf16.mxu0 %v1991_v8 }
 0x116   :  { %1904 = vmatpush3.bf16.msra.mxu1 %v2080_v20 }
 0x117   :  { %1905 = vmatprep.subr.bf16.mxu1 %v1991_v8 }
 0x118   :  { %1886 = vmatpush3.bf16.msra.mxu0 %v2106_v29 }
 0x119   :  { %1887 = vmatprep.subr.bf16.mxu0 %v1991_v8 }
 0x11a   :  { %1907 = vmatpush3.bf16.msra.mxu1 %v2093_v25 }
 0x11b   :  { %1908 = vmatprep.subr.bf16.mxu1 %v1991_v8 }
 0x11c   :  { %1889 = vmatpush3.bf16.msra.mxu0 %v2119_v32 }
 0x11d   :  { %1890 = vmatprep.subr.bf16.mxu0 %v1991_v8 }
 0x11e   :  { %1910 = vmatpush3.bf16.msra.mxu1 %v2106_v29 }
 0x11f   :  { %1911 = vmatprep.subr.bf16.mxu1 %v1991_v8 }
 0x120   :  { %1892 = vmatpush3.bf16.msra.mxu0 %v2132_v36 }
 0x122   :  { %1913 = vmatpush3.bf16.msra.mxu1 %v2119_v32 }
 0x123   :  { %1914 = vmatprep.subr.bf16.mxu1 %v1991_v8  ;;  %1592 = vmatmul.mubr.msk.f32.vlgmr.msra.gmra.mrb[2].mxu0 %vm796_vm11, %v2004_v42 }
 0x126   :  { %1916 = vmatpush3.bf16.msra.mxu1 %v2132_v36 }
 0x129   :  { %1627 = vmatmul.mubr.msk.f32.vlgmr.msra.gmra.mrb[2].mxu1 %vm873_vm12, %v2004_v42 }
 0x1d6   :  { %v711_v54 = vpop.f32.mrb[0].mxu0 }
 0x1d7   :  { %948 = vst.msk [vmem:[#allocation2] sm:$0xff] %vm947_vm13, %v711_v54  ;;  %v1523_v55 = vpop.f32.mrb[1].mxu0 }
 0x1dc   :  { %v788_v56 = vpop.f32.mrb[0].mxu1 }
 0x1dd   :  { %950 = vrot.lane.b32.xlu1 %v788_v56, %s2005_s1  ;;  %v1558_v57 = vpop.f32.mrb[1].mxu1 }
 0x1f6   :  { %v865_v58 = vpop.f32.mrb[2].mxu0 }
 0x1f7   :  { %956 = vrot.lane.b32.xlu1 %v865_v58, %s2006_s14  ;;  %v1593_v59 = vpop.f32.mrb[3].mxu0 }
 0x1fc   :  { %v942_v60 = vpop.f32.mrb[2].mxu1 }
 0x1fd   :  { %962 = vrot.lane.b32.xlu0 %v942_v60, %s2007_s15  ;;  %v1628_v61 = vpop.f32.mrb[3].mxu1 }
 0x24f   :  { %v951_v62 = vpop.permute.xlu1 %950 }
 0x250   :  { %954 = vst.msk [vmem:[#allocation2] sm:$0xff] %vm953_vm14, %v951_v62 }
 0x269   :  { %v957_v63 = vpop.permute.xlu1 %956 }
 0x26a   :  { %960 = vst.msk [vmem:[#allocation2] sm:$0xff] %vm959_vm15, %v957_v63 }
 0x26f   :  { %v963_v0 = vpop.permute.xlu0 %962 }
 0x270   :  { %966 = vst.msk [vmem:[#allocation2] sm:$0xff] %vm965_vm0, %v963_v0 }
 0x271   :  { %1976 = shalt.err (!%p1973_p4)
}
 0x272   :  { %s1977_s20 = scalar_lea.hbm %s2361_s2, 128 }
 0x273   :  { %p1978_p5 = scmp.ne.s32.totalorder %s2361_s2, %s1977_s20  ;;  %p1981_p6 = scmp.lt.u32.totalorder %s1977_s20, %s2361_s2 }
 0x275   :  { %p1983_p7 = pnand %p1981_p6, %p1978_p5 }
 0x277   :  { %1986 = shalt.err (!%p1983_p7)
}
 0x278   :  { %976 = dma.vmem_to_hbm [thread:$0]  %s974_s0, 128, %s2361_s2, [#allocation3]  }
 0x279   :  { %1987 = dma.done.wait [#allocation3], 128  }
 0x27a   :  { %1988 = vsyncadd [#allocation3], 4294967168 }
 0x27b   :  { %980 = vsyncpa [#allocation3], 1 }

</bundles_post_ra>
